<compile_context>
chip_gen: v6e
topology: v6e:2x2x1
jax: 0.10.0
libtpu: 0.0.40
codegen_flags: <defaults>
</compile_context>

<pallas_src>
import jax
import jax.numpy as jnp
from jax.experimental import pallas as pl
from jax.experimental.pallas import tpu as pltpu


def _round_up(x, m):
    return ((x + m - 1) // m) * m


def _cdiv(a, b):
    return (a + b - 1) // b


def _pick_pack(state_size):
    # Pack P batch rows into the contraction dim so K = P*S fills the MXU depth
    # (256 on v6e/v7x). On v5e (128-deep MXU) K=128 packing would also do, but
    # K=256 still cuts push count ~4x vs. the unpacked K=32 layout.
    P = 1
    while P < 8 and (2 * P) * state_size <= 256:
        P *= 2
    return P


def _block_diag(w, P):
    """[kin, kout] -> block-diagonal [P*kin, P*kout] with w repeated on the diagonal."""
    kin, kout = w.shape
    out = jnp.zeros((P, kin, P, kout), w.dtype)
    out = out.at[jnp.arange(P), :, jnp.arange(P), :].set(w)
    return out.reshape(P * kin, P * kout)


def _mlp_kernel(x_ref, w1_ref, b1_ref, w2_ref, b2_ref, w3_ref, b3_ref, o_ref):
    # Layer 0: bf16 MXU matmul (K = P*S), f32 accumulate; bias + ReLU in f32.
    h = jnp.dot(x_ref[...], w1_ref[...], preferred_element_type=jnp.float32)
    h = jnp.maximum(h + b1_ref[...], 0.0)
    # Layer 1: block-diagonal bf16 MXU matmul.
    h = jnp.dot(h.astype(jnp.bfloat16), w2_ref[...],
                preferred_element_type=jnp.float32)
    h = jnp.maximum(h + b2_ref[...], 0.0)
    # Value head: tiny block-diagonal MXU matmul -> (tbp, P); b3 scalar from SMEM.
    v = jnp.dot(h.astype(jnp.bfloat16), w3_ref[...],
                preferred_element_type=jnp.float32)
    o_ref[...] = (v + b3_ref[0]).astype(o_ref.dtype)


def init_ppo_critic_params(key, state_size, hidden_layers):
    """PyTorch nn.Linear-style init: U(-1/sqrt(fan_in), 1/sqrt(fan_in)).
    Raw (unpacked) f32 params, weights stored [in, out]."""
    dims = [state_size] + list(hidden_layers) + [1]
    params = {}
    for idx in range(len(dims) - 1):
        fan_in, fan_out = dims[idx], dims[idx + 1]
        key, kw, kb = jax.random.split(key, 3)
        lim = 1.0 / (fan_in ** 0.5)
        params[f"w{idx + 1}"] = jax.random.uniform(
            kw, (fan_in, fan_out), jnp.float32, -lim, lim)
        params[f"b{idx + 1}"] = jax.random.uniform(
            kb, (fan_out,), jnp.float32, -lim, lim)
    return params


def pack_ppo_critic_params(params, pack=None):
    """Build the block-diagonal, MXU-packed resident weights once, at init time."""
    w1, b1 = params["w1"], params["b1"]     # [S, H0], [H0]
    w2, b2 = params["w2"], params["b2"]     # [H0, H1], [H1]
    w3, b3 = params["w3"], params["b3"]     # [H1, 1], [1]
    S = w1.shape[0]
    P = _pick_pack(S) if pack is None else int(pack)
    return {
        "pack": P,
        "state_size": S,
        "w1": _block_diag(w1, P).astype(jnp.bfloat16),   # [P*S,  P*H0] bf16
        "b1": jnp.tile(b1.reshape(1, -1), (1, P)),       # [1,    P*H0] f32
        "w2": _block_diag(w2, P).astype(jnp.bfloat16),   # [P*H0, P*H1] bf16
        "b2": jnp.tile(b2.reshape(1, -1), (1, P)),       # [1,    P*H1] f32
        "w3": _block_diag(w3, P).astype(jnp.bfloat16),   # [P*H1, P]    bf16
        "b3": b3.reshape(1).astype(jnp.float32),         # (1,) f32 scalar (SMEM)
    }


def ppo_critic_forward(state, packed, *, block_rows=8192):
    """state: [B, state_size] f32. packed: dict from pack_ppo_critic_params."""
    P = packed["pack"]
    S = packed["state_size"]
    w1, b1 = packed["w1"], packed["b1"]
    w2, b2 = packed["w2"], packed["b2"]
    w3, b3 = packed["w3"], packed["b3"]

    B, S_in = state.shape
    assert S_in == S
    K = w1.shape[0]        # P*S
    N1 = w1.shape[1]       # P*H0
    N2 = w2.shape[1]       # P*H1

    # Tile size in *packed* rows: multiple of 8, capped by block_rows original
    # rows, and shrunk so the grid has >= 2 steps whenever the batch allows it
    # (lets "parallel" shard across v7x's two TensorCores; harmless elsewhere).
    Bp = _cdiv(B, P)
    cap = max(8, _round_up(block_rows // P, 8))
    tbp = min(cap, max(8, _round_up(_cdiv(Bp, 2), 8)))
    Bp_pad = _round_up(Bp, tbp)
    B_pad = Bp_pad * P

    x = state.astype(jnp.bfloat16)
    if B_pad != B:
        x = jnp.pad(x, ((0, B_pad - B), (0, 0)))
    # Free row-major reshape: 4/8 consecutive batch rows become one 256-wide row.
    x = x.reshape(Bp_pad, K)

    resident = lambda shape: pl.BlockSpec(shape, lambda i: (0, 0))

    out = pl.pallas_call(
        _mlp_kernel,
        out_shape=jax.ShapeDtypeStruct((Bp_pad, P), jnp.float32),
        grid=(Bp_pad // tbp,),
        in_specs=[
            pl.BlockSpec((tbp, K), lambda i: (i, 0)),           # streamed packed x
            resident((K, N1)),                                  # W1 (block-diag)
            resident((1, N1)),                                  # b1 (tiled)
            resident((N1, N2)),                                 # W2 (block-diag)
            resident((1, N2)),                                  # b2 (tiled)
            resident((N2, P)),                                  # w3 (block-diag)
            pl.BlockSpec(memory_space=pltpu.MemorySpace.SMEM),  # b3 scalar
        ],
        out_specs=pl.BlockSpec((tbp, P), lambda i: (i, 0)),
        compiler_params=pltpu.CompilerParams(
            dimension_semantics=("parallel",),
            vmem_limit_bytes=32 * 1024 * 1024,
        ),
    )(x, w1, b1, w2, b2, w3, b3)

    # (Bp_pad, P) row-major flatten restores original batch order exactly.
    return out.reshape(B_pad, 1)[:B]


def _reference_forward(state, params):
    """Pure-JAX reference mirroring the kernel's bf16 matmul-input precision."""
    f = lambda a: a.astype(jnp.bfloat16).astype(jnp.float32)
    x = f(state)
    h = jnp.maximum(x @ f(params["w1"]) + params["b1"][None, :], 0.0)
    h = jnp.maximum(f(h) @ f(params["w2"]) + params["b2"][None, :], 0.0)
    return f(h) @ f(params["w3"]) + params["b3"]


if __name__ == "__main__":
    # Small shapes consistent with the module: batch=8, state_size=32, hidden=[64, 32]
    batch = 8
    state_size = 32
    hidden_layers = [64, 32]

    key = jax.random.PRNGKey(0)
    key, k_state = jax.random.split(key)
    state = jax.random.normal(k_state, (batch, state_size), jnp.float32)

    params = init_ppo_critic_params(key, state_size, hidden_layers)
    packed = pack_ppo_critic_params(params)

    v = ppo_critic_forward(state, packed)
    v = jax.block_until_ready(v)

    v_ref = _reference_forward(state, params)
    assert v.shape == (batch, 1), v.shape
    assert jnp.allclose(v, v_ref, atol=2e-2, rtol=2e-2), (v, v_ref)

    print("KERNEL_OK")
</pallas_src>

<mosaic_0001>
module attributes {stable_mosaic.version = 11 : i64} {
  func.func @_mlp_kernel(%arg0: i32, %arg1: memref<8x256xbf16, #tpu.memory_space<vmem>>, %arg2: memref<256x512xbf16, #tpu.memory_space<vmem>>, %arg3: memref<1x512xf32, #tpu.memory_space<vmem>>, %arg4: memref<512x256xbf16, #tpu.memory_space<vmem>>, %arg5: memref<1x256xf32, #tpu.memory_space<vmem>>, %arg6: memref<256x8xbf16, #tpu.memory_space<vmem>>, %arg7: memref<1xf32, #tpu.memory_space<smem>>, %arg8: memref<8x8xf32, #tpu.memory_space<vmem>>) attributes {dimension_semantics = [#tpu.dimension_semantics<parallel>], iteration_bounds = array<i64: 1>, scalar_prefetch = 0 : i64, scratch_operands = 0 : i64, tpu.core_type = #tpu.core_type<tc>, window_params = [{transform_indices = @transform_0, window_bounds = array<i64: 8, 256>}, {pipeline_mode = #tpu.pipeline_mode<synchronous>, transform_indices = @transform_1, window_bounds = array<i64: 256, 512>}, {pipeline_mode = #tpu.pipeline_mode<synchronous>, transform_indices = @transform_2, window_bounds = array<i64: 1, 512>}, {pipeline_mode = #tpu.pipeline_mode<synchronous>, transform_indices = @transform_3, window_bounds = array<i64: 512, 256>}, {pipeline_mode = #tpu.pipeline_mode<synchronous>, transform_indices = @transform_4, window_bounds = array<i64: 1, 256>}, {pipeline_mode = #tpu.pipeline_mode<synchronous>, transform_indices = @transform_5, window_bounds = array<i64: 256, 8>}, {transform_indices = @transform_6, window_bounds = array<i64: 1>}, {transform_indices = @transform_7, window_bounds = array<i64: 8, 8>}]} {
    %c0 = arith.constant 0 : index
    %c0_0 = arith.constant 0 : index
    %0 = vector.load %arg1[%c0, %c0_0] : memref<8x256xbf16, #tpu.memory_space<vmem>>, vector<8x256xbf16>
    %c0_1 = arith.constant 0 : index
    %c0_2 = arith.constant 0 : index
    %1 = vector.load %arg2[%c0_1, %c0_2] : memref<256x512xbf16, #tpu.memory_space<vmem>>, vector<256x512xbf16>
    %cst = arith.constant dense<0.000000e+00> : vector<8x512xf32>
    %2 = tpu.matmul %0, %1, %cst {dimension_numbers = #tpu.dot_dimension_numbers<[1], [0], [0], [1], [0, 0, 1, 1], [], []>} : vector<8x256xbf16>, vector<256x512xbf16>, vector<8x512xf32> -> vector<8x512xf32>
    %c0_3 = arith.constant 0 : index
    %c0_4 = arith.constant 0 : index
    %3 = vector.load %arg3[%c0_3, %c0_4] : memref<1x512xf32, #tpu.memory_space<vmem>>, vector<1x512xf32>
    %4 = vector.broadcast %3 : vector<1x512xf32> to vector<8x512xf32>
    %5 = arith.addf %2, %4 : vector<8x512xf32>
    %cst_5 = arith.constant 0.000000e+00 : f32
    %6 = vector.broadcast %cst_5 : f32 to vector<8x512xf32>
    %7 = arith.maximumf %5, %6 : vector<8x512xf32>
    %8 = arith.truncf %7 : vector<8x512xf32> to vector<8x512xbf16>
    %c0_6 = arith.constant 0 : index
    %c0_7 = arith.constant 0 : index
    %9 = vector.load %arg4[%c0_6, %c0_7] : memref<512x256xbf16, #tpu.memory_space<vmem>>, vector<512x256xbf16>
    %cst_8 = arith.constant dense<0.000000e+00> : vector<8x256xf32>
    %10 = tpu.matmul %8, %9, %cst_8 {dimension_numbers = #tpu.dot_dimension_numbers<[1], [0], [0], [1], [0, 0, 1, 1], [], []>} : vector<8x512xbf16>, vector<512x256xbf16>, vector<8x256xf32> -> vector<8x256xf32>
    %c0_9 = arith.constant 0 : index
    %c0_10 = arith.constant 0 : index
    %11 = vector.load %arg5[%c0_9, %c0_10] : memref<1x256xf32, #tpu.memory_space<vmem>>, vector<1x256xf32>
    %12 = vector.broadcast %11 : vector<1x256xf32> to vector<8x256xf32>
    %13 = arith.addf %10, %12 : vector<8x256xf32>
    %cst_11 = arith.constant 0.000000e+00 : f32
    %14 = vector.broadcast %cst_11 : f32 to vector<8x256xf32>
    %15 = arith.maximumf %13, %14 : vector<8x256xf32>
    %16 = arith.truncf %15 : vector<8x256xf32> to vector<8x256xbf16>
    %c0_12 = arith.constant 0 : index
    %c0_13 = arith.constant 0 : index
    %17 = vector.load %arg6[%c0_12, %c0_13] : memref<256x8xbf16, #tpu.memory_space<vmem>>, vector<256x8xbf16>
    %cst_14 = arith.constant dense<0.000000e+00> : vector<8x8xf32>
    %18 = tpu.matmul %16, %17, %cst_14 {dimension_numbers = #tpu.dot_dimension_numbers<[1], [0], [0], [1], [0, 0, 1, 1], [], []>} : vector<8x256xbf16>, vector<256x8xbf16>, vector<8x8xf32> -> vector<8x8xf32>
    %c0_15 = arith.constant 0 : index
    %19 = memref.load %arg7[%c0_15] : memref<1xf32, #tpu.memory_space<smem>>
    %20 = vector.broadcast %19 : f32 to vector<8x8xf32>
    %21 = arith.addf %18, %20 : vector<8x8xf32>
    %c0_16 = arith.constant 0 : index
    %c0_17 = arith.constant 0 : index
    %22 = vector.load %arg8[%c0_16, %c0_17] : memref<8x8xf32, #tpu.memory_space<vmem>>, vector<8x8xf32>
    tpu.vector_store %arg8[%c0_16, %c0_17], %21 {strides = array<i32>} : memref<8x8xf32, #tpu.memory_space<vmem>>, vector<8x8xf32>,
    return
  }
  func.func @transform_0(%arg0: i32) -> (i32, i32) {
    %c0_i32 = arith.constant 0 : i32
    %c0_i32_0 = arith.constant 0 : i32
    return %arg0, %c0_i32 : i32, i32
  }
  func.func @transform_1(%arg0: i32) -> (i32, i32) {
    %c0_i32 = arith.constant 0 : i32
    %c0_i32_0 = arith.constant 0 : i32
    %c0_i32_1 = arith.constant 0 : i32
    return %c0_i32, %c0_i32_0 : i32, i32
  }
  func.func @transform_2(%arg0: i32) -> (i32, i32) {
    %c0_i32 = arith.constant 0 : i32
    %c0_i32_0 = arith.constant 0 : i32
    %c0_i32_1 = arith.constant 0 : i32
    return %c0_i32, %c0_i32_0 : i32, i32
  }
  func.func @transform_3(%arg0: i32) -> (i32, i32) {
    %c0_i32 = arith.constant 0 : i32
    %c0_i32_0 = arith.constant 0 : i32
    %c0_i32_1 = arith.constant 0 : i32
    return %c0_i32, %c0_i32_0 : i32, i32
  }
  func.func @transform_4(%arg0: i32) -> (i32, i32) {
    %c0_i32 = arith.constant 0 : i32
    %c0_i32_0 = arith.constant 0 : i32
    %c0_i32_1 = arith.constant 0 : i32
    return %c0_i32, %c0_i32_0 : i32, i32
  }
  func.func @transform_5(%arg0: i32) -> (i32, i32) {
    %c0_i32 = arith.constant 0 : i32
    %c0_i32_0 = arith.constant 0 : i32
    %c0_i32_1 = arith.constant 0 : i32
    return %c0_i32, %c0_i32_0 : i32, i32
  }
  func.func @transform_6(%arg0: i32) -> i32 {
    %c0_i32 = arith.constant 0 : i32
    %c0_i32_0 = arith.constant 0 : i32
    return %c0_i32 : i32
  }
  func.func @transform_7(%arg0: i32) -> (i32, i32) {
    %c0_i32 = arith.constant 0 : i32
    %c0_i32_0 = arith.constant 0 : i32
    return %arg0, %c0_i32 : i32, i32
  }
}

</mosaic_0001>

<bundles_post_ra>
// kernel: tpu_custom_call.1
= control target key start
LH: loop header
LB: loop body
LE: loop exit
PB: predicated region body
PF: predicated region fallthrough
CT: control target
= control target key end

     0   :  { %13 = vsyncpa [#allocation4], 0  ;;  %s1808_s0 = inlined_call_operand.vmem [shape: bf16[8,256], index: 0, kind: input, shape index: {}]   ;;  %s1809_s1 = inlined_call_operand.hbm [shape: bf16[256,512], index: 1, kind: input, shape index: {}]   ;;  %s1810_s2 = inlined_call_operand.vmem [shape: f32[1,512], index: 2, kind: input, shape index: {}]   ;;  %s1811_s3 = inlined_call_operand.hbm [shape: bf16[512,256], index: 3, kind: input, shape index: {}]   ;;  %s1812_s4 = inlined_call_operand.vmem [shape: f32[1,256], index: 4, kind: input, shape index: {}]   ;;  %s1813_s5 = inlined_call_operand.vmem [shape: bf16[256,8], index: 5, kind: input, shape index: {}]   ;;  %s1814_s6 = inlined_call_operand.<no memory space> [shape: f32[1], index: 6, kind: input, shape index: {}]   ;;  %s1815_s7 = inlined_call_operand.hbm [shape: f32[8,8], index: 7, kind: output, shape index: {}]  }
   0x1   :  { %14 = vsyncpa [#allocation7], 0 }
   0x2   :  { %15 = vsyncpa [#allocation5], 0  ;;  %s1682_s24 = smov [#allocation3]  }
   0x3   :  { %s23_s25 = sshll.u32 %s1682_s24, 4  ;;  %s24_s25 = int_to_ptr.vmem [resolvable:$true] %s23_s25 }
   0x4   :  { %s1624_s26 = scalar_lea.vmem %s24_s25, 8192  ;;  %p1629_p1 = scmp.lt.s32.totalorder %s24_s25, %s24_s25 }
   0x5   :  { %p1625_p0 = scmp.ne.s32.totalorder %s24_s25, %s1624_s26  ;;  %p1630_p2 = scmp.lt.s32.totalorder %s1624_s26, %s1624_s26 }
   0x7   :  { %p1631_p3 = por %p1630_p2, %p1629_p1 }
   0x9   :  { %p1632_p4 = pnand %p1631_p3, %p1625_p0 }
   0xb   :  { %1635 = shalt.err (!%p1632_p4)
}
   0xc   :  { %s1683_s27 = smov 256   ;;  %s1684_s28 = smov 16  }
   0xd   :  { %29 = dma.hbm_to_vmem [thread:$0]  %s1809_s1, 8192, %s24_s25, [#allocation4], %s1683_s27, %s1683_s27, %s1684_s28  }
   0xe   :  { %s1685_s8 = smov [#allocation6]  }
   0xf   :  { %s37_s9 = sshll.u32 %s1685_s8, 4  ;;  %s38_s9 = int_to_ptr.vmem [resolvable:$true] %s37_s9 }
  0x10   :  { %s1644_s10 = scalar_lea.vmem %s38_s9, 8192  ;;  %p1649_p6 = scmp.lt.s32.totalorder %s38_s9, %s38_s9 }
  0x11   :  { %p1645_p5 = scmp.ne.s32.totalorder %s38_s9, %s1644_s10  ;;  %p1650_p7 = scmp.lt.s32.totalorder %s1644_s10, %s1644_s10 }
  0x13   :  { %p1651_p8 = por %p1650_p7, %p1649_p6 }
  0x15   :  { %p1652_p9 = pnand %p1651_p8, %p1645_p5 }
  0x17   :  { %1655 = shalt.err (!%p1652_p9)
}
  0x18   :  { %s1686_s11 = smov 128   ;;  %s1687_s12 = smov 8  }
  0x19   :  { %43 = dma.hbm_to_vmem [thread:$0]  %s1811_s3, 8192, %s38_s9, [#allocation7], %s1686_s11, %s1686_s11, %s1687_s12  }
  0x1a   :  { %1676 = dma.done.wait [#allocation4], 8192  }
  0x1b   :  { %1677 = vsyncadd [#allocation4], 4294959104 }
  0x1c   :  { %1678 = dma.done.wait [#allocation7], 8192  }
  0x1d   :  { %1679 = vsyncadd [#allocation7], 4294959104  ;;  %v1406_v0 = vld [vmem:[#allocation3 + $0xe4] ss:$16 sps:$4 sm:$0xff]   ;;  %v1408_v1 = vld [vmem:[#allocation3 + $0xec] ss:$16 sps:$4 sm:$0xff]  }
  0x1e   :  { %471 = vmatprep.subr.bf16.mxu0 %v1406_v0  ;;  %v1410_v2 = vld [vmem:[#allocation3 + $0xe0] ss:$16 sps:$4 sm:$0xff]   ;;  %v1411_v3 = vld [vmem:[#allocation3 + $0xe8] ss:$16 sps:$4 sm:$0xff]   ;;  %512 = vmatprep.subr.bf16.mxu1 %v1408_v1  ;;  %v1412_v4 = vld [vmem:[#allocation3 + $0xc4] ss:$16 sps:$4 sm:$0xff]  }
  0x1f   :  { %472 = vmatpush1.bf16.msra.mxu0 %v1410_v2  ;;  %513 = vmatpush1.bf16.msra.mxu1 %v1411_v3  ;;  %v1414_v5 = vld [vmem:[#allocation3 + $0xcc] ss:$16 sps:$4 sm:$0xff]   ;;  %v1416_v6 = vld [vmem:[#allocation3 + $0xc0] ss:$16 sps:$4 sm:$0xff]   ;;  %v1417_v7 = vld [vmem:[#allocation3 + $0xc8] ss:$16 sps:$4 sm:$0xff]  }
  0x20   :  { %473 = vmatprep.subr.bf16.mxu0 %v1412_v4  ;;  %514 = vmatprep.subr.bf16.mxu1 %v1414_v5  ;;  %v1418_v8 = vld [vmem:[#allocation3 + $0xa4] ss:$16 sps:$4 sm:$0xff]   ;;  %v1420_v9 = vld [vmem:[#allocation3 + $0xac] ss:$16 sps:$4 sm:$0xff]   ;;  %v1422_v10 = vld [vmem:[#allocation3 + $0xa0] ss:$16 sps:$4 sm:$0xff]  }
  0x21   :  { %v1423_v11 = vld [vmem:[#allocation3 + $0xa8] ss:$16 sps:$4 sm:$0xff]   ;;  %v1424_v12 = vld [vmem:[#allocation3 + $0x84] ss:$16 sps:$4 sm:$0xff]   ;;  %v1426_v13 = vld [vmem:[#allocation3 + $0x8c] ss:$16 sps:$4 sm:$0xff]  }
  0x22   :  { %v1428_v14 = vld [vmem:[#allocation3 + $0x80] ss:$16 sps:$4 sm:$0xff]   ;;  %v1429_v15 = vld [vmem:[#allocation3 + $0x88] ss:$16 sps:$4 sm:$0xff]   ;;  %v1430_v16 = vld [vmem:[#allocation3 + $0x64] ss:$16 sps:$4 sm:$0xff]  }
  0x23   :  { %474 = vmatpush1.bf16.msra.mxu0 %v1416_v6  ;;  %515 = vmatpush1.bf16.msra.mxu1 %v1417_v7  ;;  %v1432_v17 = vld [vmem:[#allocation3 + $0x6c] ss:$16 sps:$4 sm:$0xff]   ;;  %v1434_v18 = vld [vmem:[#allocation3 + $0x60] ss:$16 sps:$4 sm:$0xff]   ;;  %v1435_v19 = vld [vmem:[#allocation3 + $0x68] ss:$16 sps:$4 sm:$0xff]  }
  0x24   :  { %475 = vmatprep.subr.bf16.mxu0 %v1418_v8  ;;  %516 = vmatprep.subr.bf16.mxu1 %v1420_v9  ;;  %v1436_v20 = vld [vmem:[#allocation3 + $0x44] ss:$16 sps:$4 sm:$0xff]   ;;  %v1438_v21 = vld [vmem:[#allocation3 + $0x4c] ss:$16 sps:$4 sm:$0xff]   ;;  %v1440_v22 = vld [vmem:[#allocation3 + $0x40] ss:$16 sps:$4 sm:$0xff]  }
  0x25   :  { %v1441_v23 = vld [vmem:[#allocation3 + $0x48] ss:$16 sps:$4 sm:$0xff]   ;;  %v1442_v24 = vld [vmem:[#allocation3 + $0x24] ss:$16 sps:$4 sm:$0xff]   ;;  %v1444_v25 = vld [vmem:[#allocation3 + $0x2c] ss:$16 sps:$4 sm:$0xff]  }
  0x26   :  { %v1446_v26 = vld [vmem:[#allocation3 + $0x20] ss:$16 sps:$4 sm:$0xff]   ;;  %v1447_v27 = vld [vmem:[#allocation3 + $0x28] ss:$16 sps:$4 sm:$0xff]   ;;  %v1448_v28 = vld [vmem:[#allocation3 + $0x4] ss:$16 sps:$4 sm:$0xff]  }
  0x27   :  { %476 = vmatpush1.bf16.msra.mxu0 %v1422_v10  ;;  %517 = vmatpush1.bf16.msra.mxu1 %v1423_v11  ;;  %v1450_v29 = vld [vmem:[#allocation3 + $0xc] ss:$16 sps:$4 sm:$0xff]   ;;  %v1452_v30 = vld [vmem:[#allocation3] ss:$16 sps:$4 sm:$0xff]   ;;  %v1453_v31 = vld [vmem:[#allocation3 + $0x8] ss:$16 sps:$4 sm:$0xff]  }
  0x28   :  { %477 = vmatprep.subr.bf16.mxu0 %v1424_v12  ;;  %518 = vmatprep.subr.bf16.mxu1 %v1426_v13  ;;  %v1454_v32 = vld [vmem:[#allocation3 + $0x1e4] ss:$16 sps:$4 sm:$0xff]   ;;  %v1456_v33 = vld [vmem:[#allocation3 + $0x1ec] ss:$16 sps:$4 sm:$0xff]   ;;  %v1458_v34 = vld [vmem:[#allocation3 + $0x1e0] ss:$16 sps:$4 sm:$0xff]  }
  0x29   :  { %v1459_v35 = vld [vmem:[#allocation3 + $0x1e8] ss:$16 sps:$4 sm:$0xff]   ;;  %v1460_v36 = vld [vmem:[#allocation3 + $0x1c4] ss:$16 sps:$4 sm:$0xff]   ;;  %v1462_v37 = vld [vmem:[#allocation3 + $0x1cc] ss:$16 sps:$4 sm:$0xff]  }
  0x2a   :  { %v1464_v38 = vld [vmem:[#allocation3 + $0x1c0] ss:$16 sps:$4 sm:$0xff]   ;;  %v1465_v39 = vld [vmem:[#allocation3 + $0x1c8] ss:$16 sps:$4 sm:$0xff]   ;;  %v1466_v40 = vld [vmem:[#allocation3 + $0x1a4] ss:$16 sps:$4 sm:$0xff]  }
  0x2b   :  { %478 = vmatpush1.bf16.msra.mxu0 %v1428_v14  ;;  %519 = vmatpush1.bf16.msra.mxu1 %v1429_v15  ;;  %v1468_v41 = vld [vmem:[#allocation3 + $0x1ac] ss:$16 sps:$4 sm:$0xff]   ;;  %v1470_v42 = vld [vmem:[#allocation3 + $0x1a0] ss:$16 sps:$4 sm:$0xff]   ;;  %v1471_v43 = vld [vmem:[#allocation3 + $0x1a8] ss:$16 sps:$4 sm:$0xff]  }
  0x2c   :  { %479 = vmatprep.subr.bf16.mxu0 %v1430_v16  ;;  %520 = vmatprep.subr.bf16.mxu1 %v1432_v17  ;;  %v1472_v44 = vld [vmem:[#allocation3 + $0x184] ss:$16 sps:$4 sm:$0xff]   ;;  %v1474_v45 = vld [vmem:[#allocation3 + $0x18c] ss:$16 sps:$4 sm:$0xff]   ;;  %v1476_v47 = vld [vmem:[#allocation3 + $0x180] ss:$16 sps:$4 sm:$0xff]  }
  0x2d   :  { %v57_v46 = vld [vmem:[%s1808_s0] sm:$0xff]  ;;  %v1477_v49 = vld [vmem:[#allocation3 + $0x188] ss:$16 sps:$4 sm:$0xff]   ;;  %v1480_v51 = vld [vmem:[#allocation3 + $0x16c] ss:$16 sps:$4 sm:$0xff]   ;;  %s1688_s22 = smov [#allocation8]  }
  0x2e   :  { %v1232_v48 = vcombine.high %v57_v46, %v57_v46  ;;  %v1478_v50 = vld [vmem:[#allocation3 + $0x164] ss:$16 sps:$4 sm:$0xff]   ;;  %v1482_v52 = vld [vmem:[#allocation3 + $0x160] ss:$16 sps:$4 sm:$0xff]   ;;  %v1483_v53 = vld [vmem:[#allocation3 + $0x168] ss:$16 sps:$4 sm:$0xff]   ;;  %v1231_v4 = vcombine.low %v57_v46, %v57_v46 }
  0x2f   :  { %480 = vmatpush1.bf16.msra.mxu0 %v1434_v18  ;;  %521 = vmatpush1.bf16.msra.mxu1 %v1435_v19  ;;  %v1484_v54 = vld [vmem:[#allocation3 + $0x144] ss:$16 sps:$4 sm:$0xff]   ;;  %v1486_v55 = vld [vmem:[#allocation3 + $0x14c] ss:$16 sps:$4 sm:$0xff]   ;;  %v1488_v56 = vld [vmem:[#allocation3 + $0x140] ss:$16 sps:$4 sm:$0xff]  }
  0x30   :  { %481 = vmatprep.subr.bf16.mxu0 %v1436_v20  ;;  %522 = vmatprep.subr.bf16.mxu1 %v1438_v21  ;;  %v1489_v57 = vld [vmem:[#allocation3 + $0x148] ss:$16 sps:$4 sm:$0xff]   ;;  %v1490_v58 = vld [vmem:[#allocation3 + $0x124] ss:$16 sps:$4 sm:$0xff]   ;;  %v1492_v59 = vld [vmem:[#allocation3 + $0x12c] ss:$16 sps:$4 sm:$0xff]  }
  0x31   :  { %503 = vmatprep.mubr.bf16.mxu0 %v1232_v48  ;;  %544 = vmatprep.mubr.bf16.mxu1 %v1232_v48  ;;  %v1494_v60 = vld [vmem:[#allocation3 + $0x120] ss:$16 sps:$4 sm:$0xff]   ;;  %v1495_v61 = vld [vmem:[#allocation3 + $0x128] ss:$16 sps:$4 sm:$0xff]   ;;  %v1496_v62 = vld [vmem:[#allocation3 + $0x104] ss:$16 sps:$4 sm:$0xff]  }
  0x32   :  { %v1498_v63 = vld [vmem:[#allocation3 + $0x10c] ss:$16 sps:$4 sm:$0xff]   ;;  %v1500_v0 = vld [vmem:[#allocation3 + $0x100] ss:$16 sps:$4 sm:$0xff]   ;;  %v1501_v1 = vld [vmem:[#allocation3 + $0x108] ss:$16 sps:$4 sm:$0xff]  }
  0x33   :  { %482 = vmatpush1.bf16.msra.mxu0 %v1440_v22  ;;  %523 = vmatpush1.bf16.msra.mxu1 %v1441_v23  ;;  %v1506_v2 = vld [vmem:[#allocation6 + $0x74] ss:$8 sps:$4 sm:$0xff]   ;;  %v1504_v5 = vld [vmem:[#allocation6 + $0x70] ss:$8 sps:$4 sm:$0xff]   ;;  %v1512_v7 = vld [vmem:[#allocation6 + $0x64] ss:$8 sps:$4 sm:$0xff]  }
  0x34   :  { %483 = vmatprep.subr.bf16.mxu0 %v1442_v24  ;;  %524 = vmatprep.subr.bf16.mxu1 %v1444_v25  ;;  %v1509_v3 = vld [vmem:[#allocation6 + $0x174] ss:$8 sps:$4 sm:$0xff]   ;;  %v1507_v6 = vld [vmem:[#allocation6 + $0x170] ss:$8 sps:$4 sm:$0xff]   ;;  %v1515_v8 = vld [vmem:[#allocation6 + $0x164] ss:$8 sps:$4 sm:$0xff]  }
  0x35   :  { %v1510_v9 = vld [vmem:[#allocation6 + $0x60] ss:$8 sps:$4 sm:$0xff]   ;;  %v1518_v11 = vld [vmem:[#allocation6 + $0x54] ss:$8 sps:$4 sm:$0xff]   ;;  %v1516_v13 = vld [vmem:[#allocation6 + $0x50] ss:$8 sps:$4 sm:$0xff]  }
  0x36   :  { %v1513_v10 = vld [vmem:[#allocation6 + $0x160] ss:$8 sps:$4 sm:$0xff]   ;;  %v1521_v12 = vld [vmem:[#allocation6 + $0x154] ss:$8 sps:$4 sm:$0xff]   ;;  %v1519_v14 = vld [vmem:[#allocation6 + $0x150] ss:$8 sps:$4 sm:$0xff]  }
  0x37   :  { %484 = vmatpush1.bf16.msra.mxu0 %v1446_v26  ;;  %525 = vmatpush1.bf16.msra.mxu1 %v1447_v27  ;;  %v1524_v15 = vld [vmem:[#allocation6 + $0x44] ss:$8 sps:$4 sm:$0xff]   ;;  %v1522_v17 = vld [vmem:[#allocation6 + $0x40] ss:$8 sps:$4 sm:$0xff]   ;;  %v1530_v19 = vld [vmem:[#allocation6 + $0x34] ss:$8 sps:$4 sm:$0xff]  }
  0x38   :  { %485 = vmatprep.subr.bf16.mxu0 %v1448_v28  ;;  %526 = vmatprep.subr.bf16.mxu1 %v1450_v29  ;;  %v1527_v16 = vld [vmem:[#allocation6 + $0x144] ss:$8 sps:$4 sm:$0xff]   ;;  %v1525_v18 = vld [vmem:[#allocation6 + $0x140] ss:$8 sps:$4 sm:$0xff]   ;;  %v1533_v20 = vld [vmem:[#allocation6 + $0x134] ss:$8 sps:$4 sm:$0xff]  }
  0x39   :  { %v1528_v21 = vld [vmem:[#allocation6 + $0x30] ss:$8 sps:$4 sm:$0xff]   ;;  %v1536_v23 = vld [vmem:[#allocation6 + $0x24] ss:$8 sps:$4 sm:$0xff]   ;;  %v1534_v25 = vld [vmem:[#allocation6 + $0x20] ss:$8 sps:$4 sm:$0xff]  }
  0x3a   :  { %v1531_v22 = vld [vmem:[#allocation6 + $0x130] ss:$8 sps:$4 sm:$0xff]   ;;  %v1539_v24 = vld [vmem:[#allocation6 + $0x124] ss:$8 sps:$4 sm:$0xff]   ;;  %v1537_v26 = vld [vmem:[#allocation6 + $0x120] ss:$8 sps:$4 sm:$0xff]  }
  0x3b   :  { %486 = vmatpush1.bf16.msra.mxu0 %v1452_v30  ;;  %527 = vmatpush1.bf16.msra.mxu1 %v1453_v31  ;;  %v1542_v27 = vld [vmem:[#allocation6 + $0x14] ss:$8 sps:$4 sm:$0xff]   ;;  %v1540_v29 = vld [vmem:[#allocation6 + $0x10] ss:$8 sps:$4 sm:$0xff]   ;;  %v1548_v31 = vld [vmem:[#allocation6 + $0x4] ss:$8 sps:$4 sm:$0xff]  }
  0x3c   :  { %487 = vmatprep.subr.bf16.mxu0 %v1454_v32  ;;  %528 = vmatprep.subr.bf16.mxu1 %v1456_v33  ;;  %v1545_v28 = vld [vmem:[#allocation6 + $0x114] ss:$8 sps:$4 sm:$0xff]   ;;  %v1543_v30 = vld [vmem:[#allocation6 + $0x110] ss:$8 sps:$4 sm:$0xff]   ;;  %v1551_v32 = vld [vmem:[#allocation6 + $0x104] ss:$8 sps:$4 sm:$0xff]  }
  0x3d   :  { %v1546_v33 = vld [vmem:[#allocation6] ss:$8 sps:$4 sm:$0xff]   ;;  %v1567_v46 = vld [vmem:[#allocation6 + $0x1d0] ss:$8 sps:$4 sm:$0xff]   ;;  %v1575_v48 = vld [vmem:[#allocation6 + $0x1c4] ss:$8 sps:$4 sm:$0xff]  }
  0x3e   :  { %s1221_s23 = sshll.u32 %s1688_s22, 4  ;;  %vm1213_vm0 = vcmask 64512   ;;  %s1222_s23 = int_to_ptr.vmem [resolvable:$true] %s1221_s23 }
  0x3f   :  { %488 = vmatpush2.bf16.msra.mxu0 %v1458_v34  ;;  %529 = vmatpush2.bf16.msra.mxu1 %v1459_v35  ;;  %v1549_v34 = vld [vmem:[#allocation6 + $0x100] ss:$8 sps:$4 sm:$0xff]   ;;  %v1554_v35 = vld [vmem:[#allocation6 + $0xf4] ss:$8 sps:$4 sm:$0xff]   ;;  %s1656_s24 = scalar_lea.vmem %s1222_s23, 128  ;;  %p1661_p11 = scmp.lt.s32.totalorder %s1222_s23, %s1222_s23 }
  0x40   :  { %489 = vmatprep.subr.bf16.mxu0 %v1460_v36  ;;  %530 = vmatprep.subr.bf16.mxu1 %v1462_v37  ;;  %v1557_v36 = vld [vmem:[#allocation6 + $0x1f4] ss:$8 sps:$4 sm:$0xff]   ;;  %v1552_v37 = vld [vmem:[#allocation6 + $0xf0] ss:$8 sps:$4 sm:$0xff]   ;;  %p1657_p10 = scmp.ne.s32.totalorder %s1222_s23, %s1656_s24  ;;  %p1662_p12 = scmp.lt.s32.totalorder %s1656_s24, %s1656_s24 }
  0x42   :  { %p1663_p13 = por %p1662_p12, %p1661_p11 }
  0x43   :  { %490 = vmatpush2.bf16.msra.mxu0 %v1464_v38  ;;  %531 = vmatpush2.bf16.msra.mxu1 %v1465_v39  ;;  %v1555_v38 = vld [vmem:[#allocation6 + $0x1f0] ss:$8 sps:$4 sm:$0xff]   ;;  %v1560_v39 = vld [vmem:[#allocation6 + $0xe4] ss:$8 sps:$4 sm:$0xff]  }
  0x44   :  { %491 = vmatprep.subr.bf16.mxu0 %v1466_v40  ;;  %532 = vmatprep.subr.bf16.mxu1 %v1468_v41  ;;  %v1563_v40 = vld [vmem:[#allocation6 + $0x1e4] ss:$8 sps:$4 sm:$0xff]   ;;  %v1558_v41 = vld [vmem:[#allocation6 + $0xe0] ss:$8 sps:$4 sm:$0xff]   ;;  %p1664_p0 = pnand %p1663_p13, %p1657_p10 }
  0x47   :  { %492 = vmatpush2.bf16.msra.mxu0 %v1470_v42  ;;  %533 = vmatpush2.bf16.msra.mxu1 %v1471_v43  ;;  %v1561_v42 = vld [vmem:[#allocation6 + $0x1e0] ss:$8 sps:$4 sm:$0xff]   ;;  %v1566_v43 = vld [vmem:[#allocation6 + $0xd4] ss:$8 sps:$4 sm:$0xff]  }
  0x48   :  { %493 = vmatprep.subr.bf16.mxu0 %v1472_v44  ;;  %534 = vmatprep.subr.bf16.mxu1 %v1474_v45  ;;  %v1569_v44 = vld [vmem:[#allocation6 + $0x1d4] ss:$8 sps:$4 sm:$0xff]   ;;  %v1564_v45 = vld [vmem:[#allocation6 + $0xd0] ss:$8 sps:$4 sm:$0xff]  }
  0x4b   :  { %494 = vmatpush2.bf16.msra.mxu0 %v1476_v47  ;;  %535 = vmatpush2.bf16.msra.mxu1 %v1477_v49  ;;  %v1572_v47 = vld [vmem:[#allocation6 + $0xc4] ss:$8 sps:$4 sm:$0xff]   ;;  %v1570_v49 = vld [vmem:[#allocation6 + $0xc0] ss:$8 sps:$4 sm:$0xff]  }
  0x4c   :  { %495 = vmatprep.subr.bf16.mxu0 %v1478_v50  ;;  %536 = vmatprep.subr.bf16.mxu1 %v1480_v51  ;;  %v1573_v50 = vld [vmem:[#allocation6 + $0x1c0] ss:$8 sps:$4 sm:$0xff]   ;;  %v1578_v51 = vld [vmem:[#allocation6 + $0xb4] ss:$8 sps:$4 sm:$0xff]  }
  0x4f   :  { %496 = vmatpush2.bf16.msra.mxu0 %v1482_v52  ;;  %537 = vmatpush2.bf16.msra.mxu1 %v1483_v53  ;;  %v1581_v52 = vld [vmem:[#allocation6 + $0x1b4] ss:$8 sps:$4 sm:$0xff]   ;;  %v1576_v53 = vld [vmem:[#allocation6 + $0xb0] ss:$8 sps:$4 sm:$0xff]  }
  0x50   :  { %497 = vmatprep.subr.bf16.mxu0 %v1484_v54  ;;  %538 = vmatprep.subr.bf16.mxu1 %v1486_v55  ;;  %v1579_v54 = vld [vmem:[#allocation6 + $0x1b0] ss:$8 sps:$4 sm:$0xff]   ;;  %v1584_v55 = vld [vmem:[#allocation6 + $0xa4] ss:$8 sps:$4 sm:$0xff]  }
  0x53   :  { %498 = vmatpush2.bf16.msra.mxu0 %v1488_v56  ;;  %539 = vmatpush2.bf16.msra.mxu1 %v1489_v57  ;;  %v1587_v56 = vld [vmem:[#allocation6 + $0x1a4] ss:$8 sps:$4 sm:$0xff]   ;;  %v1582_v57 = vld [vmem:[#allocation6 + $0xa0] ss:$8 sps:$4 sm:$0xff]  }
  0x54   :  { %499 = vmatprep.subr.bf16.mxu0 %v1490_v58  ;;  %540 = vmatprep.subr.bf16.mxu1 %v1492_v59  ;;  %v1585_v58 = vld [vmem:[#allocation6 + $0x1a0] ss:$8 sps:$4 sm:$0xff]   ;;  %v1590_v59 = vld [vmem:[#allocation6 + $0x94] ss:$8 sps:$4 sm:$0xff]  }
  0x57   :  { %500 = vmatpush2.bf16.msra.mxu0 %v1494_v60  ;;  %541 = vmatpush2.bf16.msra.mxu1 %v1495_v61  ;;  %v1593_v60 = vld [vmem:[#allocation6 + $0x194] ss:$8 sps:$4 sm:$0xff]   ;;  %v1588_v61 = vld [vmem:[#allocation6 + $0x90] ss:$8 sps:$4 sm:$0xff]  }
  0x58   :  { %501 = vmatprep.subr.bf16.mxu0 %v1496_v62  ;;  %542 = vmatprep.subr.bf16.mxu1 %v1498_v63  ;;  %v1591_v62 = vld [vmem:[#allocation6 + $0x190] ss:$8 sps:$4 sm:$0xff]   ;;  %v1596_v63 = vld [vmem:[#allocation6 + $0x84] ss:$8 sps:$4 sm:$0xff]  }
  0x5b   :  { %502 = vmatpush2.bf16.msra.mxu0 %v1500_v0  ;;  %543 = vmatpush2.bf16.msra.mxu1 %v1501_v1  ;;  %v1599_v0 = vld [vmem:[#allocation6 + $0x184] ss:$8 sps:$4 sm:$0xff]   ;;  %v1594_v1 = vld [vmem:[#allocation6 + $0x80] ss:$8 sps:$4 sm:$0xff]  }
  0x5c   :  { %957 = vmatprep.subr.bf16.mxu0 %v1506_v2  ;;  %998 = vmatprep.subr.bf16.mxu1 %v1509_v3  ;;  %v1597_v2 = vld [vmem:[#allocation6 + $0x180] ss:$8 sps:$4 sm:$0xff]   ;;  %v1600_v3 = vld [vmem:[%s1813_s5 + $0x78] sm:$0xff]  }
  0x5e   :  { %504 = vmatmul.mubr.bf16.vlgmr.msra.gmra.mxu0 %v1231_v4  ;;  %545 = vmatmul.mubr.bf16.vlgmr.msra.gmra.mxu1 %v1231_v4  ;;  %v124_v4 = vlaneseq }
  0x5f   :  { %958 = vmatpush1.bf16.msra.mxu0 %v1504_v5  ;;  %999 = vmatpush1.bf16.msra.mxu1 %v1507_v6 }
  0x60   :  { %959 = vmatprep.subr.bf16.mxu0 %v1512_v7  ;;  %1000 = vmatprep.subr.bf16.mxu1 %v1515_v8  ;;  %v1741_v5 = vshrl.u32 %v124_v4, 7  ;;  %v122_v8 = vld [vmem:[%s1810_s2] sm:$0xf] }
  0x62   :  { %v126_v6 = vsub.s32 0, %v1741_v5  ;;  %v134_v7 = vsub.s32 2, %v1741_v5 }
  0x63   :  { %960 = vmatpush1.bf16.msra.mxu0 %v1510_v9  ;;  %1001 = vmatpush1.bf16.msra.mxu1 %v1513_v10  ;;  %v130_v9 = vsub.s32 1, %v1741_v5  ;;  %v138_v10 = vsub.s32 3, %v1741_v5 }
  0x64   :  { %961 = vmatprep.subr.bf16.mxu0 %v1518_v11  ;;  %1002 = vmatprep.subr.bf16.mxu1 %v1521_v12  ;;  %v127_v11 = vrot.slane %v122_v8, %v126_v6  ;;  %v135_v12 = vrot.slane %v122_v8, %v134_v7 }
  0x67   :  { %962 = vmatpush1.bf16.msra.mxu0 %v1516_v13  ;;  %1003 = vmatpush1.bf16.msra.mxu1 %v1519_v14  ;;  %v131_v13 = vrot.slane %v122_v8, %v130_v9  ;;  %v139_v14 = vrot.slane %v122_v8, %v138_v10 }
  0x68   :  { %963 = vmatprep.subr.bf16.mxu0 %v1524_v15  ;;  %1004 = vmatprep.subr.bf16.mxu1 %v1527_v16 }
  0x6b   :  { %964 = vmatpush1.bf16.msra.mxu0 %v1522_v17  ;;  %1005 = vmatpush1.bf16.msra.mxu1 %v1525_v18 }
  0x6c   :  { %965 = vmatprep.subr.bf16.mxu0 %v1530_v19  ;;  %1006 = vmatprep.subr.bf16.mxu1 %v1533_v20 }
  0x6f   :  { %966 = vmatpush1.bf16.msra.mxu0 %v1528_v21  ;;  %1007 = vmatpush1.bf16.msra.mxu1 %v1531_v22 }
  0x70   :  { %967 = vmatprep.subr.bf16.mxu0 %v1536_v23  ;;  %1008 = vmatprep.subr.bf16.mxu1 %v1539_v24 }
  0x73   :  { %968 = vmatpush1.bf16.msra.mxu0 %v1534_v25  ;;  %1009 = vmatpush1.bf16.msra.mxu1 %v1537_v26 }
  0x74   :  { %969 = vmatprep.subr.bf16.mxu0 %v1542_v27  ;;  %1010 = vmatprep.subr.bf16.mxu1 %v1545_v28 }
  0x77   :  { %970 = vmatpush1.bf16.msra.mxu0 %v1540_v29  ;;  %1011 = vmatpush1.bf16.msra.mxu1 %v1543_v30 }
  0x78   :  { %971 = vmatprep.subr.bf16.mxu0 %v1548_v31  ;;  %1012 = vmatprep.subr.bf16.mxu1 %v1551_v32 }
  0x7b   :  { %972 = vmatpush1.bf16.msra.mxu0 %v1546_v33  ;;  %1013 = vmatpush1.bf16.msra.mxu1 %v1549_v34  ;;  %v1601_v34 = vld [vmem:[%s1813_s5 + $0x38] sm:$0xff]  }
  0x7c   :  { %973 = vmatprep.subr.bf16.mxu0 %v1554_v35  ;;  %1014 = vmatprep.subr.bf16.mxu1 %v1557_v36  ;;  %v1602_v36 = vld [vmem:[%s1813_s5 + $0x70] sm:$0xff]  }
  0x7f   :  { %974 = vmatpush2.bf16.msra.mxu0 %v1552_v37  ;;  %1015 = vmatpush2.bf16.msra.mxu1 %v1555_v38  ;;  %v1603_v37 = vld [vmem:[%s1813_s5 + $0x30] sm:$0xff]   ;;  %v1604_v38 = vld [vmem:[%s1813_s5 + $0x68] sm:$0xff]  }
  0x80   :  { %975 = vmatprep.subr.bf16.mxu0 %v1560_v39  ;;  %1016 = vmatprep.subr.bf16.mxu1 %v1563_v40  ;;  %v1605_v39 = vld [vmem:[%s1813_s5 + $0x28] sm:$0xff]   ;;  %v1606_v40 = vld [vmem:[%s1813_s5 + $0x60] sm:$0xff]  }
  0x83   :  { %976 = vmatpush2.bf16.msra.mxu0 %v1558_v41  ;;  %1017 = vmatpush2.bf16.msra.mxu1 %v1561_v42  ;;  %v1607_v41 = vld [vmem:[%s1813_s5 + $0x20] sm:$0xff]   ;;  %v1608_v42 = vld [vmem:[%s1813_s5 + $0x58] sm:$0xff]  }
  0x84   :  { %977 = vmatprep.subr.bf16.mxu0 %v1566_v43  ;;  %1018 = vmatprep.subr.bf16.mxu1 %v1569_v44  ;;  %v1609_v43 = vld [vmem:[%s1813_s5 + $0x18] sm:$0xff]   ;;  %v1610_v44 = vld [vmem:[%s1813_s5 + $0x50] sm:$0xff]  }
  0x87   :  { %978 = vmatpush2.bf16.msra.mxu0 %v1564_v45  ;;  %1019 = vmatpush2.bf16.msra.mxu1 %v1567_v46  ;;  %v1611_v45 = vld [vmem:[%s1813_s5 + $0x10] sm:$0xff]   ;;  %v1612_v46 = vld [vmem:[%s1813_s5 + $0x48] sm:$0xff]  }
  0x88   :  { %979 = vmatprep.subr.bf16.mxu0 %v1572_v47  ;;  %1020 = vmatprep.subr.bf16.mxu1 %v1575_v48  ;;  %v1613_v47 = vld [vmem:[%s1813_s5 + $0x8] sm:$0xff]   ;;  %v1614_v48 = vld [vmem:[%s1813_s5 + $0x40] sm:$0xff]  }
  0x8b   :  { %980 = vmatpush2.bf16.msra.mxu0 %v1570_v49  ;;  %1021 = vmatpush2.bf16.msra.mxu1 %v1573_v50  ;;  %v1615_v49 = vld [vmem:[%s1813_s5] sm:$0xff]  }
  0x8c   :  { %981 = vmatprep.subr.bf16.mxu0 %v1578_v51  ;;  %1022 = vmatprep.subr.bf16.mxu1 %v1581_v52  ;;  %v625_v50 = vld [vmem:[%s1812_s4] sm:$0x3] }
  0x8d   :  { %v630_v51 = vrot.slane %v625_v50, %v126_v6  ;;  %v634_v52 = vrot.slane %v625_v50, %v130_v9  ;;  %v1076_v6 = vstv %s1814_s6 }
  0x8f   :  { %982 = vmatpush2.bf16.msra.mxu0 %v1576_v53  ;;  %1023 = vmatpush2.bf16.msra.mxu1 %v1579_v54 }
  0x90   :  { %983 = vmatprep.subr.bf16.mxu0 %v1584_v55  ;;  %1024 = vmatprep.subr.bf16.mxu1 %v1587_v56 }
  0x93   :  { %984 = vmatpush2.bf16.msra.mxu0 %v1582_v57  ;;  %1025 = vmatpush2.bf16.msra.mxu1 %v1585_v58 }
  0x94   :  { %985 = vmatprep.subr.bf16.mxu0 %v1590_v59  ;;  %1026 = vmatprep.subr.bf16.mxu1 %v1593_v60 }
  0x97   :  { %986 = vmatpush2.bf16.msra.mxu0 %v1588_v61  ;;  %1027 = vmatpush2.bf16.msra.mxu1 %v1591_v62 }
  0x98   :  { %987 = vmatprep.subr.bf16.mxu0 %v1596_v63  ;;  %1028 = vmatprep.subr.bf16.mxu1 %v1599_v0 }
  0x9b   :  { %988 = vmatpush2.bf16.msra.mxu0 %v1594_v1  ;;  %1029 = vmatpush2.bf16.msra.mxu1 %v1597_v2 }
  0x9c   :  { %1377 = vmatprep.subr.bf16.mxu0 %v1600_v3 }
 0x11e   :  { %v505_v15 = vpop.f32.mrf.mxu0  ;;  %v546_v16 = vpop.f32.mrf.mxu1 }
 0x11f   :  { %v506_v17 = vadd.f32 %v505_v15, %v127_v11  ;;  %v547_v18 = vadd.f32 %v546_v16, %v135_v12 }
 0x120   :  { %v507_v19 = vpop.f32.mrf.mxu0  ;;  %v548_v20 = vpop.f32.mrf.mxu1 }
 0x121   :  { %v555_v21 = vmax.f32 %v547_v18, 0.0  ;;  %v508_v22 = vadd.f32 %v507_v19, %v131_v13  ;;  %v549_v23 = vadd.f32 %v548_v20, %v139_v14  ;;  %v553_v24 = vmax.f32 %v506_v17, 0.0 }
 0x122   :  { %v509_v25 = vpop.f32.mrf.mxu0  ;;  %v550_v26 = vpop.f32.mrf.mxu1 }
 0x123   :  { %v554_v27 = vmax.f32 %v508_v22, 0.0  ;;  %v556_v28 = vmax.f32 %v549_v23, 0.0  ;;  %v559_v29 = vpack.c.bf16 %v555_v21, %v555_v21  ;;  %v557_v35 = vpack.c.bf16 %v553_v24, %v553_v24 }
 0x124   :  { %v510_v30 = vpop.f32.mrf.mxu0  ;;  %v551_v31 = vpop.f32.mrf.mxu1 }
 0x125   :  { %v558_v32 = vpack.c.bf16 %v554_v27, %v554_v27  ;;  %v560_v33 = vpack.c.bf16 %v556_v28, %v556_v28 }
 0x127   :  { %989 = vmatprep.mubr.bf16.mxu0 %v558_v32  ;;  %1030 = vmatprep.mubr.bf16.mxu1 %v560_v33 }
 0x128   :  { %990 = vmatmul.mubr.bf16.vlgmr.msra.gmra.mxu0 %v557_v35  ;;  %1031 = vmatmul.mubr.bf16.vlgmr.msra.gmra.mxu1 %v559_v29 }
 0x129   :  { %1378 = vmatpush3.bf16.msra.mxu0 %v1601_v34 }
 0x12a   :  { %1379 = vmatprep.subr.bf16.mxu0 %v1602_v36 }
 0x12d   :  { %1380 = vmatpush3.bf16.msra.mxu0 %v1603_v37 }
 0x12e   :  { %1381 = vmatprep.subr.bf16.mxu0 %v1604_v38 }
 0x131   :  { %1382 = vmatpush3.bf16.msra.mxu0 %v1605_v39 }
 0x132   :  { %1383 = vmatprep.subr.bf16.mxu0 %v1606_v40 }
 0x135   :  { %1384 = vmatpush3.bf16.msra.mxu0 %v1607_v41 }
 0x136   :  { %1385 = vmatprep.subr.bf16.mxu0 %v1608_v42 }
 0x139   :  { %1386 = vmatpush3.bf16.msra.mxu0 %v1609_v43 }
 0x13a   :  { %1387 = vmatprep.subr.bf16.mxu0 %v1610_v44 }
 0x13d   :  { %1388 = vmatpush3.bf16.msra.mxu0 %v1611_v45 }
 0x13e   :  { %1389 = vmatprep.subr.bf16.mxu0 %v1612_v46 }
 0x141   :  { %1390 = vmatpush3.bf16.msra.mxu0 %v1613_v47 }
 0x142   :  { %1391 = vmatprep.subr.bf16.mxu0 %v1614_v48 }
 0x145   :  { %1392 = vmatpush3.bf16.msra.mxu0 %v1615_v49 }
 0x1e8   :  { %v991_v53 = vpop.f32.mrf.mxu0  ;;  %v1032_v54 = vpop.f32.mrf.mxu1 }
 0x1e9   :  { %v992_v55 = vadd.f32 %v991_v53, %v630_v51 }
 0x1ea   :  { %v993_v56 = vpop.f32.mrf.mxu0  ;;  %v1034_v57 = vpop.f32.mrf.mxu1 }
 0x1eb   :  { %v1033_v58 = vadd.f32 %v1032_v54, %v992_v55  ;;  %v994_v59 = vadd.f32 %v993_v56, %v634_v52 }
 0x1ec   :  { %v995_v60 = vpop.f32.mrf.mxu0  ;;  %v1036_v61 = vpop.f32.mrf.mxu1 }
 0x1ed   :  { %v1035_v62 = vadd.f32 %v1034_v57, %v994_v59  ;;  %v1039_v63 = vmax.f32 %v1033_v58, 0.0 }
 0x1ee   :  { %v996_v0 = vpop.f32.mrf.mxu0  ;;  %v1037_v1 = vpop.f32.mrf.mxu1 }
 0x1ef   :  { %v1040_v2 = vmax.f32 %v1035_v62, 0.0  ;;  %v1041_v4 = vpack.c.bf16 %v1039_v63, %v1039_v63 }
 0x1f1   :  { %v1042_v3 = vpack.c.bf16 %v1040_v2, %v1040_v2 }
 0x1f3   :  { %1205 = vmatprep.mubr.bf16.mxu0 %v1042_v3 }
 0x1f4   :  { %1206 = vmatmul.mubr.bf16.vlgmr.msra.gmra.mxu0 %v1041_v4 }
 0x2b4   :  { %v1393_v5 = vpop.f32.mrf.mxu0 }
 0x2b6   :  { %v1394_v7 = vpop.f32.mrf.mxu0 }
 0x2b7   :  { %v1395_v8 = vadd.f32 %v1394_v7, %v1393_v5 }
 0x2b8   :  { %v1396_v9 = vpop.f32.mrf.mxu0 }
 0x2b9   :  { %v1208_v10 = vadd.f32 %v1395_v8, %v1076_v6 }
 0x2ba   :  { %v1397_v11 = vpop.f32.mrf.mxu0 }
 0x2bb   :  { %1214 = vst.msk [vmem:[#allocation8] sm:$0xff] %vm1213_vm0, %v1208_v10 }
 0x2bc   :  { %1667 = shalt.err (!%p1664_p0)
}
 0x2bd   :  { %1224 = dma.vmem_to_hbm [thread:$0]  %s1222_s23, 128, %s1815_s7, [#allocation5]  }
 0x2be   :  { %1680 = dma.done.wait [#allocation5], 128  }
 0x2bf   :  { %1681 = vsyncadd [#allocation5], 4294967168 }
 0x2c0   :  { %1228 = vsyncpa [#allocation4], 1 }
 0x2c1   :  { %1229 = vsyncpa [#allocation7], 1 }
 0x2c2   :  { %1230 = vsyncpa [#allocation5], 1 }

</bundles_post_ra>
